<compile_context>
chip_gen: v6e
topology: v6e:2x2x1
jax: 0.10.0
libtpu: 0.0.40
codegen_flags: <defaults>
</compile_context>

<pallas_src>
import jax
import jax.numpy as jnp
from jax.experimental import pallas as pl
from jax.experimental.pallas import tpu as pltpu

EDGE_DIM = 3


def _gcn_kernel(x_ref, ea4_ref, src_ref, idx_ref, w0_ref, bias_ref,
                a_ref, r_ref, wout_ref, bout_ref, out_ref):
    f32 = jnp.float32
    E = ea4_ref.shape[0]
    N = x_ref.shape[0]
    G = out_ref.shape[0]
    H = w0_ref.shape[1]

    # ---- One-hot gather / scatter / pool masks built in-kernel from int32
    # indices (values are exactly 0/1; out-of-range indices contribute zeros).
    src = src_ref[...]                     # [E, 1] source node j per edge
    dst = idx_ref[0:1, :E]                 # [1, E] target node i per edge
    bat = idx_ref[1:2, :N]                 # [1, N] graph id per node
    gsrc = (jax.lax.broadcasted_iota(jnp.int32, (E, N), 1) == src).astype(f32)  # [E, N]
    stgt = (jax.lax.broadcasted_iota(jnp.int32, (N, E), 0) == dst).astype(f32)  # [N, E]
    pool = (jax.lax.broadcasted_iota(jnp.int32, (G, N), 0) == bat).astype(f32)  # [G, N]

    # ---- Hoisted lane-dense edge factor [E, 4H] = [ea0 | ea1 | ea2 | 1],
    # built once from the padded [E, 4] edge_attr and reused by all 3 convs.
    ea_wide = jnp.concatenate(
        [jnp.broadcast_to(ea4_ref[:, d:d + 1], (E, H)) for d in range(4)], axis=1)

    # ---- Node embedding + ReLU.
    h = jnp.maximum(
        jnp.dot(x_ref[...], w0_ref[...], preferred_element_type=f32)
        + bias_ref[0:1, :], 0.0)

    # ---- Three NNConv(aggr='add') layers; per-layer params sliced from stacks.
    for l in range(3):
        # Gather source-node features per edge: [E, H].
        # TODO(synk): replace dense one-hot matmul with a scalar-prefetch row
        # gather / segment-sum over an edge-tiled grid when graphs grow.
        x_src = jnp.dot(gsrc, h, preferred_element_type=f32)
        # Fused per-edge weighted matmul:
        #   msg[e,o] = sum_{d,k} (ea[e,d]*x_src[e,k]) * A[d*H+k, o]
        #            + sum_k     x_src[e,k]           * B[k, o]
        # as ONE K = (EDGE_DIM+1)*H = 128 MXU dot (A stacked over B in wrapper).
        z4 = ea_wide * jnp.concatenate([x_src, x_src, x_src, x_src], axis=1)  # [E, 4H]
        msg = jnp.dot(z4, a_ref[l], preferred_element_type=f32)               # [E, H]
        # Scatter-add onto target nodes + root transform + bias, ReLU.
        agg = jnp.dot(stgt, msg, preferred_element_type=f32)                  # [N, H]
        h = jnp.maximum(
            agg + jnp.dot(h, r_ref[l], preferred_element_type=f32)
            + bias_ref[l + 1:l + 2, :], 0.0)

    # global_add_pool -> final linear.
    pooled = jnp.dot(pool, h, preferred_element_type=f32)                     # [G, H]
    out_ref[...] = (jnp.dot(pooled, wout_ref[...], preferred_element_type=f32)
                    + bout_ref[...])


def simple_gcn_forward(params, x, edge_index, edge_attr, batch, num_graphs):
    n = x.shape[0]
    e = edge_attr.shape[0]
    hidden = params["w0"].shape[1]
    c_out = params["w_out"].shape[1]
    m = max(e, n)

    # Re-layout edge-MLP params so the per-edge weighted matmul is ONE matmul:
    #   A[d*H+k, o] = we[d, k*H+o]   stacked over   B[k, o] = be[k*H+o]
    def fold(we, be):
        a = we.reshape(EDGE_DIM * hidden, hidden)
        b = be.reshape(hidden, hidden)
        return jnp.concatenate([a, b], axis=0)            # [(EDGE_DIM+1)*H, H]

    a_all = jnp.stack([fold(params["we1"], params["be1"]),
                       fold(params["we2"], params["be2"]),
                       fold(params["we3"], params["be3"])])              # [3, 4H, H]
    r_all = jnp.stack([params["r1"], params["r2"], params["r3"]])        # [3, H, H]
    bias_all = jnp.stack([params["b0"], params["c1"],
                          params["c2"], params["c3"]])                   # [4, H]

    # edge_attr padded with a ones column -> single aligned [E, 4] load in-kernel.
    ea4 = jnp.concatenate([edge_attr.astype(jnp.float32),
                           jnp.ones((e, 1), jnp.float32)], axis=1)       # [E, 4]

    # Only small int32 index arrays cross HBM; one-hots are built in-kernel.
    src = edge_index[0].reshape(e, 1).astype(jnp.int32)                  # [E, 1]
    idx = jnp.full((2, m), n, dtype=jnp.int32)
    idx = idx.at[0, :e].set(edge_index[1].astype(jnp.int32))             # dst row
    idx = idx.at[1, :n].set(batch.astype(jnp.int32))                     # batch row

    args = [x, ea4, src, idx,
            params["w0"], bias_all, a_all, r_all,
            params["w_out"], params["b_out"].reshape(1, -1)]

    vmem = pl.BlockSpec(memory_space=pltpu.MemorySpace.VMEM)
    return pl.pallas_call(
        _gcn_kernel,
        out_shape=jax.ShapeDtypeStruct((num_graphs, c_out), jnp.float32),
        in_specs=[vmem] * len(args),
        out_specs=vmem,
    )(*args)


def simple_gcn_reference(params, x, edge_index, edge_attr, batch, num_graphs):
    """Pure-JAX reference matching PyG NNConv(aggr='add') semantics."""
    hidden = params["w0"].shape[1]
    relu = lambda v: jnp.maximum(v, 0.0)
    h = relu(x @ params["w0"] + params["b0"])
    src, dst = edge_index[0], edge_index[1]

    def conv(h, we, be, r, c):
        w = (edge_attr @ we + be).reshape(-1, hidden, hidden)   # [E, H, H]
        x_src = h[src]                                          # [E, H]
        msg = jnp.einsum("eh,eho->eo", x_src, w)
        agg = jax.ops.segment_sum(msg, dst, num_segments=h.shape[0])
        return relu(agg + h @ r + c)

    h = conv(h, params["we1"], params["be1"], params["r1"], params["c1"])
    h = conv(h, params["we2"], params["be2"], params["r2"], params["c2"])
    h = conv(h, params["we3"], params["be3"], params["r3"], params["c3"])
    pooled = jax.ops.segment_sum(h, batch, num_segments=num_graphs)
    return pooled @ params["w_out"] + params["b_out"]


def init_params(key, in_channels, hidden, out_channels, edge_dim):
    ks = jax.random.split(key, 8)

    def lin(k, fan_in, fan_out, scale=1.0):
        bound = scale / jnp.sqrt(jnp.float32(fan_in))
        kw, kb = jax.random.split(k)
        w = jax.random.uniform(kw, (fan_in, fan_out), jnp.float32, -bound, bound)
        b = jax.random.uniform(kb, (fan_out,), jnp.float32, -bound, bound)
        return w, b

    w0, b0 = lin(ks[0], in_channels, hidden)
    we1, be1 = lin(ks[1], edge_dim, hidden * hidden, scale=0.1)
    we2, be2 = lin(ks[2], edge_dim, hidden * hidden, scale=0.1)
    we3, be3 = lin(ks[3], edge_dim, hidden * hidden, scale=0.1)
    r1, c1 = lin(ks[4], hidden, hidden)
    r2, c2 = lin(ks[5], hidden, hidden)
    r3, c3 = lin(ks[6], hidden, hidden)
    w_out, b_out = lin(ks[7], hidden, out_channels)
    return dict(w0=w0, b0=b0,
                we1=we1, be1=be1, r1=r1, c1=c1,
                we2=we2, be2=be2, r2=r2, c2=c2,
                we3=we3, be3=be3, r3=r3, c3=c3,
                w_out=w_out, b_out=b_out)


if __name__ == "__main__":
    IN_CHANNELS, HIDDEN, OUT_CHANNELS = 4, 32, 2
    NUM_GRAPHS, NODES_PER_GRAPH = 2, 8
    N = NUM_GRAPHS * NODES_PER_GRAPH          # 16 nodes
    E_PER_GRAPH = 16
    E = NUM_GRAPHS * E_PER_GRAPH              # 32 edges

    key = jax.random.PRNGKey(0)
    k_params, k_x, k_ea, k_src, k_dst = jax.random.split(key, 5)

    params = init_params(k_params, IN_CHANNELS, HIDDEN, OUT_CHANNELS, EDGE_DIM)

    x = jax.random.normal(k_x, (N, IN_CHANNELS), jnp.float32)
    edge_attr = jax.random.normal(k_ea, (E, EDGE_DIM), jnp.float32)

    # within-graph random edges; edge_index[0]=source j, edge_index[1]=target i
    src_keys = jax.random.split(k_src, NUM_GRAPHS)
    dst_keys = jax.random.split(k_dst, NUM_GRAPHS)
    src = jnp.concatenate([
        jax.random.randint(src_keys[g], (E_PER_GRAPH,),
                           g * NODES_PER_GRAPH, (g + 1) * NODES_PER_GRAPH)
        for g in range(NUM_GRAPHS)])
    dst = jnp.concatenate([
        jax.random.randint(dst_keys[g], (E_PER_GRAPH,),
                           g * NODES_PER_GRAPH, (g + 1) * NODES_PER_GRAPH)
        for g in range(NUM_GRAPHS)])
    edge_index = jnp.stack([src, dst]).astype(jnp.int32)          # [2, E]
    batch = jnp.repeat(jnp.arange(NUM_GRAPHS, dtype=jnp.int32), NODES_PER_GRAPH)

    out = simple_gcn_forward(params, x, edge_index, edge_attr, batch, NUM_GRAPHS)
    out = jax.block_until_ready(out)

    ref = simple_gcn_reference(params, x, edge_index, edge_attr, batch, NUM_GRAPHS)
    ref = jax.block_until_ready(ref)

    assert out.shape == (NUM_GRAPHS, OUT_CHANNELS)
    assert jnp.allclose(out, ref, rtol=1e-3, atol=1e-3), (out, ref)

    print("KERNEL_OK")
</pallas_src>

<mosaic_0001>
module attributes {stable_mosaic.version = 11 : i64} {
  func.func @_gcn_kernel(%arg0: memref<16x4xf32, #tpu.memory_space<vmem>>, %arg1: memref<32x4xf32, #tpu.memory_space<vmem>>, %arg2: memref<32x1xi32, #tpu.memory_space<vmem>>, %arg3: memref<2x32xi32, #tpu.memory_space<vmem>>, %arg4: memref<4x32xf32, #tpu.memory_space<vmem>>, %arg5: memref<4x32xf32, #tpu.memory_space<vmem>>, %arg6: memref<3x128x32xf32, #tpu.memory_space<vmem>>, %arg7: memref<3x32x32xf32, #tpu.memory_space<vmem>>, %arg8: memref<32x2xf32, #tpu.memory_space<vmem>>, %arg9: memref<1x2xf32, #tpu.memory_space<vmem>>, %arg10: memref<2x2xf32, #tpu.memory_space<vmem>>) attributes {dimension_semantics = [], scalar_prefetch = 0 : i64, scratch_operands = 0 : i64, tpu.core_type = #tpu.core_type<tc>} {
    %c0 = arith.constant 0 : index
    %c0_0 = arith.constant 0 : index
    %0 = vector.load %arg2[%c0, %c0_0] : memref<32x1xi32, #tpu.memory_space<vmem>>, vector<32x1xi32>
    %c0_1 = arith.constant 0 : index
    %c0_2 = arith.constant 0 : index
    %1 = vector.load %arg3[%c0_1, %c0_2] : memref<2x32xi32, #tpu.memory_space<vmem>>, vector<1x32xi32>
    %c1 = arith.constant 1 : index
    %c0_3 = arith.constant 0 : index
    %2 = vector.load %arg3[%c1, %c0_3] : memref<2x32xi32, #tpu.memory_space<vmem>>, vector<1x16xi32>
    %3 = tpu.iota {dimensions = array<i32: 1>} : vector<32x16xi32>
    %4 = vector.broadcast %0 : vector<32x1xi32> to vector<32x16xi32>
    %5 = arith.cmpi eq, %3, %4 : vector<32x16xi32>
    %6 = arith.extui %5 : vector<32x16xi1> to vector<32x16xi32>
    %7 = arith.sitofp %6 : vector<32x16xi32> to vector<32x16xf32>
    %8 = tpu.iota {dimensions = array<i32: 0>} : vector<16x32xi32>
    %9 = vector.broadcast %1 : vector<1x32xi32> to vector<16x32xi32>
    %10 = arith.cmpi eq, %8, %9 : vector<16x32xi32>
    %11 = arith.extui %10 : vector<16x32xi1> to vector<16x32xi32>
    %12 = arith.sitofp %11 : vector<16x32xi32> to vector<16x32xf32>
    %13 = tpu.iota {dimensions = array<i32: 0>} : vector<2x16xi32>
    %14 = vector.broadcast %2 : vector<1x16xi32> to vector<2x16xi32>
    %15 = arith.cmpi eq, %13, %14 : vector<2x16xi32>
    %16 = arith.extui %15 : vector<2x16xi1> to vector<2x16xi32>
    %17 = arith.sitofp %16 : vector<2x16xi32> to vector<2x16xf32>
    %c0_4 = arith.constant 0 : index
    %c0_5 = arith.constant 0 : index
    %18 = vector.load %arg1[%c0_4, %c0_5] : memref<32x4xf32, #tpu.memory_space<vmem>>, vector<32x1xf32>
    %19 = vector.shape_cast %18 : vector<32x1xf32> to vector<32x1xf32>
    %20 = vector.broadcast %19 : vector<32x1xf32> to vector<32x32xf32>
    %c0_6 = arith.constant 0 : index
    %c1_7 = arith.constant 1 : index
    %21 = vector.load %arg1[%c0_6, %c1_7] : memref<32x4xf32, #tpu.memory_space<vmem>>, vector<32x1xf32>
    %22 = vector.shape_cast %21 : vector<32x1xf32> to vector<32x1xf32>
    %23 = vector.broadcast %22 : vector<32x1xf32> to vector<32x32xf32>
    %c0_8 = arith.constant 0 : index
    %c2 = arith.constant 2 : index
    %24 = vector.load %arg1[%c0_8, %c2] : memref<32x4xf32, #tpu.memory_space<vmem>>, vector<32x1xf32>
    %25 = vector.shape_cast %24 : vector<32x1xf32> to vector<32x1xf32>
    %26 = vector.broadcast %25 : vector<32x1xf32> to vector<32x32xf32>
    %c0_9 = arith.constant 0 : index
    %c3 = arith.constant 3 : index
    %27 = vector.load %arg1[%c0_9, %c3] : memref<32x4xf32, #tpu.memory_space<vmem>>, vector<32x1xf32>
    %28 = vector.shape_cast %27 : vector<32x1xf32> to vector<32x1xf32>
    %29 = vector.broadcast %28 : vector<32x1xf32> to vector<32x32xf32>
    %30 = tpu.concatenate %20, %23, %26, %29 in 1 : vector<32x32xf32>, vector<32x32xf32>, vector<32x32xf32>, vector<32x32xf32> -> vector<32x128xf32>
    %c0_10 = arith.constant 0 : index
    %c0_11 = arith.constant 0 : index
    %31 = vector.load %arg0[%c0_10, %c0_11] : memref<16x4xf32, #tpu.memory_space<vmem>>, vector<16x4xf32>
    %c0_12 = arith.constant 0 : index
    %c0_13 = arith.constant 0 : index
    %32 = vector.load %arg4[%c0_12, %c0_13] : memref<4x32xf32, #tpu.memory_space<vmem>>, vector<4x32xf32>
    %cst = arith.constant dense<0.000000e+00> : vector<16x32xf32>
    %33 = tpu.matmul %31, %32, %cst {dimension_numbers = #tpu.dot_dimension_numbers<[1], [0], [0], [1], [0, 0, 1, 1], [], []>} : vector<16x4xf32>, vector<4x32xf32>, vector<16x32xf32> -> vector<16x32xf32>
    %c0_14 = arith.constant 0 : index
    %c0_15 = arith.constant 0 : index
    %34 = vector.load %arg5[%c0_14, %c0_15] : memref<4x32xf32, #tpu.memory_space<vmem>>, vector<1x32xf32>
    %35 = vector.broadcast %34 : vector<1x32xf32> to vector<16x32xf32>
    %36 = arith.addf %33, %35 : vector<16x32xf32>
    %cst_16 = arith.constant 0.000000e+00 : f32
    %37 = vector.broadcast %cst_16 : f32 to vector<16x32xf32>
    %38 = arith.maximumf %36, %37 : vector<16x32xf32>
    %cst_17 = arith.constant dense<0.000000e+00> : vector<32x32xf32>
    %39 = tpu.matmul %7, %38, %cst_17 {dimension_numbers = #tpu.dot_dimension_numbers<[1], [0], [0], [1], [0, 0, 1, 1], [], []>} : vector<32x16xf32>, vector<16x32xf32>, vector<32x32xf32> -> vector<32x32xf32>
    %40 = tpu.concatenate %39, %39, %39, %39 in 1 : vector<32x32xf32>, vector<32x32xf32>, vector<32x32xf32>, vector<32x32xf32> -> vector<32x128xf32>
    %41 = arith.mulf %30, %40 : vector<32x128xf32>
    %c0_18 = arith.constant 0 : index
    %c0_19 = arith.constant 0 : index
    %c0_20 = arith.constant 0 : index
    %42 = vector.load %arg6[%c0_18, %c0_19, %c0_20] : memref<3x128x32xf32, #tpu.memory_space<vmem>>, vector<1x128x32xf32>
    %43 = vector.shape_cast %42 : vector<1x128x32xf32> to vector<128x32xf32>
    %cst_21 = arith.constant dense<0.000000e+00> : vector<32x32xf32>
    %44 = tpu.matmul %41, %43, %cst_21 {dimension_numbers = #tpu.dot_dimension_numbers<[1], [0], [0], [1], [0, 0, 1, 1], [], []>} : vector<32x128xf32>, vector<128x32xf32>, vector<32x32xf32> -> vector<32x32xf32>
    %cst_22 = arith.constant dense<0.000000e+00> : vector<16x32xf32>
    %45 = tpu.matmul %12, %44, %cst_22 {dimension_numbers = #tpu.dot_dimension_numbers<[1], [0], [0], [1], [0, 0, 1, 1], [], []>} : vector<16x32xf32>, vector<32x32xf32>, vector<16x32xf32> -> vector<16x32xf32>
    %c0_23 = arith.constant 0 : index
    %c0_24 = arith.constant 0 : index
    %c0_25 = arith.constant 0 : index
    %46 = vector.load %arg7[%c0_23, %c0_24, %c0_25] : memref<3x32x32xf32, #tpu.memory_space<vmem>>, vector<1x32x32xf32>
    %47 = vector.shape_cast %46 : vector<1x32x32xf32> to vector<32x32xf32>
    %cst_26 = arith.constant dense<0.000000e+00> : vector<16x32xf32>
    %48 = tpu.matmul %38, %47, %cst_26 {dimension_numbers = #tpu.dot_dimension_numbers<[1], [0], [0], [1], [0, 0, 1, 1], [], []>} : vector<16x32xf32>, vector<32x32xf32>, vector<16x32xf32> -> vector<16x32xf32>
    %49 = arith.addf %45, %48 : vector<16x32xf32>
    %c1_27 = arith.constant 1 : index
    %c0_28 = arith.constant 0 : index
    %50 = vector.load %arg5[%c1_27, %c0_28] : memref<4x32xf32, #tpu.memory_space<vmem>>, vector<1x32xf32>
    %51 = vector.broadcast %50 : vector<1x32xf32> to vector<16x32xf32>
    %52 = arith.addf %49, %51 : vector<16x32xf32>
    %cst_29 = arith.constant 0.000000e+00 : f32
    %53 = vector.broadcast %cst_29 : f32 to vector<16x32xf32>
    %54 = arith.maximumf %52, %53 : vector<16x32xf32>
    %cst_30 = arith.constant dense<0.000000e+00> : vector<32x32xf32>
    %55 = tpu.matmul %7, %54, %cst_30 {dimension_numbers = #tpu.dot_dimension_numbers<[1], [0], [0], [1], [0, 0, 1, 1], [], []>} : vector<32x16xf32>, vector<16x32xf32>, vector<32x32xf32> -> vector<32x32xf32>
    %56 = tpu.concatenate %55, %55, %55, %55 in 1 : vector<32x32xf32>, vector<32x32xf32>, vector<32x32xf32>, vector<32x32xf32> -> vector<32x128xf32>
    %57 = arith.mulf %30, %56 : vector<32x128xf32>
    %c1_31 = arith.constant 1 : index
    %c0_32 = arith.constant 0 : index
    %c0_33 = arith.constant 0 : index
    %58 = vector.load %arg6[%c1_31, %c0_32, %c0_33] : memref<3x128x32xf32, #tpu.memory_space<vmem>>, vector<1x128x32xf32>
    %59 = vector.shape_cast %58 : vector<1x128x32xf32> to vector<128x32xf32>
    %cst_34 = arith.constant dense<0.000000e+00> : vector<32x32xf32>
    %60 = tpu.matmul %57, %59, %cst_34 {dimension_numbers = #tpu.dot_dimension_numbers<[1], [0], [0], [1], [0, 0, 1, 1], [], []>} : vector<32x128xf32>, vector<128x32xf32>, vector<32x32xf32> -> vector<32x32xf32>
    %cst_35 = arith.constant dense<0.000000e+00> : vector<16x32xf32>
    %61 = tpu.matmul %12, %60, %cst_35 {dimension_numbers = #tpu.dot_dimension_numbers<[1], [0], [0], [1], [0, 0, 1, 1], [], []>} : vector<16x32xf32>, vector<32x32xf32>, vector<16x32xf32> -> vector<16x32xf32>
    %c1_36 = arith.constant 1 : index
    %c0_37 = arith.constant 0 : index
    %c0_38 = arith.constant 0 : index
    %62 = vector.load %arg7[%c1_36, %c0_37, %c0_38] : memref<3x32x32xf32, #tpu.memory_space<vmem>>, vector<1x32x32xf32>
    %63 = vector.shape_cast %62 : vector<1x32x32xf32> to vector<32x32xf32>
    %cst_39 = arith.constant dense<0.000000e+00> : vector<16x32xf32>
    %64 = tpu.matmul %54, %63, %cst_39 {dimension_numbers = #tpu.dot_dimension_numbers<[1], [0], [0], [1], [0, 0, 1, 1], [], []>} : vector<16x32xf32>, vector<32x32xf32>, vector<16x32xf32> -> vector<16x32xf32>
    %65 = arith.addf %61, %64 : vector<16x32xf32>
    %c2_40 = arith.constant 2 : index
    %c0_41 = arith.constant 0 : index
    %66 = vector.load %arg5[%c2_40, %c0_41] : memref<4x32xf32, #tpu.memory_space<vmem>>, vector<1x32xf32>
    %67 = vector.broadcast %66 : vector<1x32xf32> to vector<16x32xf32>
    %68 = arith.addf %65, %67 : vector<16x32xf32>
    %cst_42 = arith.constant 0.000000e+00 : f32
    %69 = vector.broadcast %cst_42 : f32 to vector<16x32xf32>
    %70 = arith.maximumf %68, %69 : vector<16x32xf32>
    %cst_43 = arith.constant dense<0.000000e+00> : vector<32x32xf32>
    %71 = tpu.matmul %7, %70, %cst_43 {dimension_numbers = #tpu.dot_dimension_numbers<[1], [0], [0], [1], [0, 0, 1, 1], [], []>} : vector<32x16xf32>, vector<16x32xf32>, vector<32x32xf32> -> vector<32x32xf32>
    %72 = tpu.concatenate %71, %71, %71, %71 in 1 : vector<32x32xf32>, vector<32x32xf32>, vector<32x32xf32>, vector<32x32xf32> -> vector<32x128xf32>
    %73 = arith.mulf %30, %72 : vector<32x128xf32>
    %c2_44 = arith.constant 2 : index
    %c0_45 = arith.constant 0 : index
    %c0_46 = arith.constant 0 : index
    %74 = vector.load %arg6[%c2_44, %c0_45, %c0_46] : memref<3x128x32xf32, #tpu.memory_space<vmem>>, vector<1x128x32xf32>
    %75 = vector.shape_cast %74 : vector<1x128x32xf32> to vector<128x32xf32>
    %cst_47 = arith.constant dense<0.000000e+00> : vector<32x32xf32>
    %76 = tpu.matmul %73, %75, %cst_47 {dimension_numbers = #tpu.dot_dimension_numbers<[1], [0], [0], [1], [0, 0, 1, 1], [], []>} : vector<32x128xf32>, vector<128x32xf32>, vector<32x32xf32> -> vector<32x32xf32>
    %cst_48 = arith.constant dense<0.000000e+00> : vector<16x32xf32>
    %77 = tpu.matmul %12, %76, %cst_48 {dimension_numbers = #tpu.dot_dimension_numbers<[1], [0], [0], [1], [0, 0, 1, 1], [], []>} : vector<16x32xf32>, vector<32x32xf32>, vector<16x32xf32> -> vector<16x32xf32>
    %c2_49 = arith.constant 2 : index
    %c0_50 = arith.constant 0 : index
    %c0_51 = arith.constant 0 : index
    %78 = vector.load %arg7[%c2_49, %c0_50, %c0_51] : memref<3x32x32xf32, #tpu.memory_space<vmem>>, vector<1x32x32xf32>
    %79 = vector.shape_cast %78 : vector<1x32x32xf32> to vector<32x32xf32>
    %cst_52 = arith.constant dense<0.000000e+00> : vector<16x32xf32>
    %80 = tpu.matmul %70, %79, %cst_52 {dimension_numbers = #tpu.dot_dimension_numbers<[1], [0], [0], [1], [0, 0, 1, 1], [], []>} : vector<16x32xf32>, vector<32x32xf32>, vector<16x32xf32> -> vector<16x32xf32>
    %81 = arith.addf %77, %80 : vector<16x32xf32>
    %c3_53 = arith.constant 3 : index
    %c0_54 = arith.constant 0 : index
    %82 = vector.load %arg5[%c3_53, %c0_54] : memref<4x32xf32, #tpu.memory_space<vmem>>, vector<1x32xf32>
    %83 = vector.broadcast %82 : vector<1x32xf32> to vector<16x32xf32>
    %84 = arith.addf %81, %83 : vector<16x32xf32>
    %cst_55 = arith.constant 0.000000e+00 : f32
    %85 = vector.broadcast %cst_55 : f32 to vector<16x32xf32>
    %86 = arith.maximumf %84, %85 : vector<16x32xf32>
    %cst_56 = arith.constant dense<0.000000e+00> : vector<2x32xf32>
    %87 = tpu.matmul %17, %86, %cst_56 {dimension_numbers = #tpu.dot_dimension_numbers<[1], [0], [0], [1], [0, 0, 1, 1], [], []>} : vector<2x16xf32>, vector<16x32xf32>, vector<2x32xf32> -> vector<2x32xf32>
    %c0_57 = arith.constant 0 : index
    %c0_58 = arith.constant 0 : index
    %88 = vector.load %arg8[%c0_57, %c0_58] : memref<32x2xf32, #tpu.memory_space<vmem>>, vector<32x2xf32>
    %cst_59 = arith.constant dense<0.000000e+00> : vector<2x2xf32>
    %89 = tpu.matmul %87, %88, %cst_59 {dimension_numbers = #tpu.dot_dimension_numbers<[1], [0], [0], [1], [0, 0, 1, 1], [], []>} : vector<2x32xf32>, vector<32x2xf32>, vector<2x2xf32> -> vector<2x2xf32>
    %c0_60 = arith.constant 0 : index
    %c0_61 = arith.constant 0 : index
    %90 = vector.load %arg9[%c0_60, %c0_61] : memref<1x2xf32, #tpu.memory_space<vmem>>, vector<1x2xf32>
    %91 = vector.broadcast %90 : vector<1x2xf32> to vector<2x2xf32>
    %92 = arith.addf %89, %91 : vector<2x2xf32>
    %c0_62 = arith.constant 0 : index
    %c0_63 = arith.constant 0 : index
    %93 = vector.load %arg10[%c0_62, %c0_63] : memref<2x2xf32, #tpu.memory_space<vmem>>, vector<2x2xf32>
    tpu.vector_store %arg10[%c0_62, %c0_63], %92 {strides = array<i32>} : memref<2x2xf32, #tpu.memory_space<vmem>>, vector<2x2xf32>,
    return
  }
}

</mosaic_0001>

<bundles_post_ra>
// kernel: tpu_custom_call.1
= control target key start
LH: loop header
LB: loop body
LE: loop exit
PB: predicated region body
PF: predicated region fallthrough
CT: control target
= control target key end

     0   :  { %vm190_vm0 = vcmask 1043456   ;;  %vm183_vm1 = vcmask 31744   ;;  %v2184_v4 = vmov 0   ;;  %s2688_s0 = inlined_call_operand.vmem [shape: f32[16,4], index: 0, kind: input, shape index: {}]   ;;  %s2689_s1 = inlined_call_operand.vmem [shape: f32[32,4], index: 1, kind: input, shape index: {}]   ;;  %s2690_s2 = inlined_call_operand.vmem [shape: s32[32,1], index: 2, kind: input, shape index: {}]   ;;  %s2691_s3 = inlined_call_operand.vmem [shape: s32[2,32], index: 3, kind: input, shape index: {}]   ;;  %s2692_s4 = inlined_call_operand.vmem [shape: f32[4,32], index: 4, kind: input, shape index: {}]   ;;  %s2693_s5 = inlined_call_operand.vmem [shape: f32[4,32], index: 5, kind: input, shape index: {}]   ;;  %s2694_s6 = inlined_call_operand.vmem [shape: f32[3,128,32], index: 6, kind: input, shape index: {}]   ;;  %s2695_s7 = inlined_call_operand.vmem [shape: f32[3,32,32], index: 7, kind: input, shape index: {}]   ;;  %s2696_s8 = inlined_call_operand.vmem [shape: f32[32,2], index: 8, kind: input, shape index: {}]   ;;  %s2697_s9 = inlined_call_operand.vmem [shape: f32[1,2], index: 9, kind: input, shape index: {}]   ;;  %s2698_s10 = inlined_call_operand.hbm [shape: f32[2,2], index: 10, kind: output, shape index: {}]  }
   0x1   :  { %v177_v0 = vld [vmem:[%s2692_s4] sm:$0xf]  ;;  %v176_v2 = vld [vmem:[%s2688_s0 + $0x8] sm:$0xff]  ;;  %2151 = vset.pattern.permute.xlu0 %v2184_v4  ;;  %v38_v5 = vld [vmem:[%s2690_s2 + $0x10] sm:$0xff] }
   0x2   :  { %v175_v1 = vld [vmem:[%s2688_s0] sm:$0xff]  ;;  %1908 = vmatprep.subr.msk.mxu1 %vm190_vm0, %v177_v0 }
   0x3   :  { %1910 = vmatprep.mubr.msk.f32.mxu1 %vm183_vm1, %v175_v1  ;;  %v36_v3 = vld [vmem:[%s2690_s2] sm:$0xff]  ;;  %1909 = vmatpush3.msk.msra.mxu1 %vm190_vm0, %v177_v0 }
   0x4   :  { %15 = vsyncpa [#allocation3], 0  ;;  %1911 = vmatmul.mubr.msk.f32.vlgmr.msra.gmra.mxu1 %vm183_vm1, %v176_v2  ;;  %45 = vperm.xlu0 %2151, %v36_v3   ;;  %v37_v6 = vld [vmem:[%s2690_s2 + $0x8] sm:$0xff]  ;;  %v39_v7 = vld [vmem:[%s2690_s2 + $0x18] sm:$0xff]  ;;  %v2185_v9 = vmov 2   ;;  %v2186_v10 = vmov 1   ;;  %v42_v15 = vlaneseq }
   0x5   :  { %2152 = vset.pattern.permute.xlu1 %v2184_v4  ;;  %v88_v8 = vld [vmem:[%s2689_s1] sm:$0xff]  ;;  %v89_v11 = vld [vmem:[%s2689_s1 + $0x8] sm:$0xff]  ;;  %v91_v12 = vld [vmem:[%s2689_s1 + $0x18] sm:$0xff]  ;;  %v2187_v13 = vmov 3   ;;  %vm271_vm2 = vcmask 130048   ;;  %v2188_v18 = vmov 0.0  }
   0x6   :  { %51 = vperm.xlu1 %2152, %v38_v5   ;;  %v90_v14 = vld [vmem:[%s2689_s1 + $0x10] sm:$0xff]  ;;  %v43_v16 = vand.u32 127, %v42_v15  ;;  %v1709_v20 = vld [vmem:[%s2693_s5] ss:$0 sm:$0xff]  ;;  %v529_v30 = vld [vmem:[%s2695_s7 + $0x18] sm:$0xff]  ;;  %vm160_vm7 = vcmask 261120  }
   0x7   :  { %v528_v33 = vld [vmem:[%s2695_s7 + $0x10] sm:$0xff]  ;;  %v527_v35 = vld [vmem:[%s2695_s7 + $0x8] sm:$0xff]  ;;  %v526_v36 = vld [vmem:[%s2695_s7] sm:$0xff]  ;;  %s2189_s25 = smov 32   ;;  %s2190_s28 = smov 64   ;;  %vm165_vm8 = vcmask 523264  }
   0x8   :  { %48 = vperm.xlu0 %2151, %v37_v6   ;;  %v440_v37 = vld [vmem:[%s2694_s6 + $0x78] sm:$0xff]  ;;  %v439_v38 = vld [vmem:[%s2694_s6 + $0x70] sm:$0xff]  ;;  %v438_v39 = vld [vmem:[%s2694_s6 + $0x68] sm:$0xff]  ;;  %s2191_s2 = smov 96   ;;  %vm170_vm9 = vcmask 785408   ;;  %vm2192_vm12 = vmmov 0  }
   0x9   :  { %1923 = vmatprep.subr.mxu0 %v440_v37  ;;  %v437_v40 = vld [vmem:[%s2694_s6 + $0x60] sm:$0xff]  ;;  %v436_v41 = vld [vmem:[%s2694_s6 + $0x58] sm:$0xff]  ;;  %v435_v42 = vld [vmem:[%s2694_s6 + $0x50] sm:$0xff]  ;;  %s2193_s16 = smov [#allocation2]   ;;  %vm1684_vm14 = vcmask 9216  }
   0xa   :  { %54 = vperm.xlu1 %2152, %v39_v7   ;;  %1924 = vmatpush3.msra.mxu0 %v440_v37  ;;  %v434_v43 = vld [vmem:[%s2694_s6 + $0x48] sm:$0xff]  ;;  %v433_v44 = vld [vmem:[%s2694_s6 + $0x40] sm:$0xff]  ;;  %v432_v45 = vld [vmem:[%s2694_s6 + $0x38] sm:$0xff]  ;;  %s1692_s17 = sshll.u32 %s2193_s16, 4  ;;  %s1693_s17 = int_to_ptr.vmem [resolvable:$true] %s1692_s17 }
   0xb   :  { %1925 = vmatprep.subr.mxu0 %v439_v38  ;;  %v431_v46 = vld [vmem:[%s2694_s6 + $0x30] sm:$0xff]  ;;  %v430_v47 = vld [vmem:[%s2694_s6 + $0x28] sm:$0xff]  ;;  %v429_v48 = vld [vmem:[%s2694_s6 + $0x20] sm:$0xff]  ;;  %s2162_s18 = scalar_lea.vmem %s1693_s17, 32  ;;  %p2167_p1 = scmp.lt.s32.totalorder %s1693_s17, %s1693_s17 }
   0xc   :  { %2154 = vset.pattern.permute.xlu0 %v2185_v9  ;;  %1926 = vmatpush3.msra.mxu0 %v439_v38  ;;  %v428_v49 = vld [vmem:[%s2694_s6 + $0x18] sm:$0xff]  ;;  %v427_v50 = vld [vmem:[%s2694_s6 + $0x10] sm:$0xff]  ;;  %v426_v52 = vld [vmem:[%s2694_s6 + $0x8] sm:$0xff]  ;;  %p2163_p0 = scmp.ne.s32.totalorder %s1693_s17, %s2162_s18  ;;  %p2168_p2 = scmp.lt.s32.totalorder %s2162_s18, %s2162_s18 }
   0xd   :  { %129 = vperm.xlu0 %2154, %v88_v8   ;;  %1927 = vmatprep.subr.mxu0 %v438_v39  ;;  %v425_v54 = vld [vmem:[%s2694_s6] sm:$0xff] }
   0xe   :  { %2153 = vset.pattern.permute.xlu1 %v2186_v10  ;;  %1928 = vmatpush3.msra.mxu0 %v438_v39  ;;  %p2169_p3 = por %p2168_p2, %p2167_p1 }
   0xf   :  { %113 = vperm.xlu1 %2153, %v88_v8   ;;  %1929 = vmatprep.subr.mxu0 %v437_v40 }
  0x10   :  { %1930 = vmatpush3.msra.mxu0 %v437_v40  ;;  %p2170_p4 = pnand %p2169_p3, %p2163_p0 }
  0x11   :  { %2155 = vset.pattern.permute.xlu0 %v2184_v4  ;;  %1931 = vmatprep.subr.mxu0 %v436_v41 }
  0x12   :  { %94 = vperm.xlu0 %2155, %v88_v8   ;;  %1932 = vmatpush3.msra.mxu0 %v436_v41 }
  0x13   :  { %117 = vperm.xlu1 %2153, %v89_v11   ;;  %1933 = vmatprep.subr.mxu0 %v435_v42 }
  0x14   :  { %1934 = vmatpush3.msra.mxu0 %v435_v42 }
  0x15   :  { %1935 = vmatprep.subr.mxu0 %v434_v43 }
  0x16   :  { %99 = vperm.xlu0 %2155, %v89_v11   ;;  %1936 = vmatpush3.msra.mxu0 %v434_v43 }
  0x17   :  { %2156 = vset.pattern.permute.xlu1 %v2185_v9  ;;  %1937 = vmatprep.subr.mxu0 %v433_v44 }
  0x18   :  { %133 = vperm.xlu1 %2156, %v89_v11   ;;  %1938 = vmatpush3.msra.mxu0 %v433_v44 }
  0x19   :  { %1939 = vmatprep.subr.mxu0 %v432_v45 }
  0x1a   :  { %109 = vperm.xlu0 %2155, %v91_v12   ;;  %1940 = vmatpush3.msra.mxu0 %v432_v45 }
  0x1b   :  { %1941 = vmatprep.subr.mxu0 %v431_v46 }
  0x1c   :  { %2157 = vset.pattern.permute.xlu1 %v2187_v13  ;;  %1942 = vmatpush3.msra.mxu0 %v431_v46 }
  0x1d   :  { %145 = vperm.xlu1 %2157, %v88_v8   ;;  %1943 = vmatprep.subr.mxu0 %v430_v47 }
  0x1e   :  { %2160 = vset.pattern.permute.xlu0 %v2187_v13  ;;  %1944 = vmatpush3.msra.mxu0 %v430_v47 }
  0x1f   :  { %149 = vperm.xlu0 %2160, %v89_v11   ;;  %1945 = vmatprep.subr.mxu0 %v429_v48 }
  0x20   :  { %1946 = vmatpush3.msra.mxu0 %v429_v48 }
  0x21   :  { %2158 = vset.pattern.permute.xlu1 %v2184_v4  ;;  %1947 = vmatprep.subr.mxu0 %v428_v49 }
  0x22   :  { %104 = vperm.xlu1 %2158, %v90_v14   ;;  %1948 = vmatpush3.msra.mxu0 %v428_v49 }
  0x23   :  { %153 = vperm.xlu0 %2160, %v90_v14   ;;  %1949 = vmatprep.subr.mxu0 %v427_v50 }
  0x24   :  { %1950 = vmatpush3.msra.mxu0 %v427_v50 }
  0x25   :  { %1951 = vmatprep.subr.mxu0 %v426_v52 }
  0x26   :  { %2159 = vset.pattern.permute.xlu1 %v2186_v10  ;;  %1952 = vmatpush3.msra.mxu0 %v426_v52 }
  0x27   :  { %121 = vperm.xlu1 %2159, %v90_v14   ;;  %157 = vperm.xlu0 %2160, %v91_v12  }
  0x28   :  { %1953 = vmatprep.subr.mxu0 %v425_v54 }
  0x29   :  { %1954 = vmatpush3.msra.mxu0 %v425_v54 }
  0x2b   :  { %125 = vperm.xlu1 %2159, %v91_v12  }
  0x2f   :  { %2161 = vset.pattern.permute.xlu1 %v2185_v9 }
  0x30   :  { %137 = vperm.xlu1 %2161, %v90_v14  }
  0x34   :  { %141 = vperm.xlu1 %2161, %v91_v12  }
  0x7f   :  { %v46_v17 = vpop.permute.xlu0 %45 }
  0x80   :  { %vm56_vm3 = vcmp.eq.s32.totalorder %v43_v16, %v46_v17 }
  0x81   :  { %v2284_v19 = vsel %vm56_vm3, 1.0, %v2188_v18  ;;  %v52_v21 = vpop.permute.xlu1 %51 }
  0x82   :  { %1917 = vmatprep.mubr.msk.f32.mxu1 %vm271_vm2, %v2284_v19  ;;  %vm58_vm4 = vcmp.eq.s32.totalorder %v43_v16, %v52_v21 }
  0x83   :  { %v49_v25 = vpop.permute.xlu0 %48  ;;  %v2295_v31 = vsel %vm58_vm4, 1.0, %v2188_v18 }
  0x84   :  { %vm57_vm5 = vcmp.eq.s32.totalorder %v43_v16, %v49_v25 }
  0x85   :  { %v55_v28 = vpop.permute.xlu1 %54  ;;  %v2298_v32 = vsel %vm57_vm5, 1.0, %v2188_v18 }
  0x86   :  { %vm59_vm6 = vcmp.eq.s32.totalorder %v43_v16, %v55_v28 }
  0x87   :  { %v2306_v34 = vsel %vm59_vm6, 1.0, %v2188_v18 }
  0x88   :  { %v130_v60 = vpop.permute.xlu0 %129 }
  0x8a   :  { %v114_v57 = vpop.permute.xlu1 %113 }
  0x8d   :  { %v95_v62 = vpop.permute.xlu0 %94 }
  0x8e   :  { %v118_v58 = vpop.permute.xlu1 %117  ;;  %v161_v13 = vsel %vm160_vm7, %v95_v62, %v114_v57  ;;  %v1704_v57 = vld [vmem:[%s2691_s3] ss:$0 sm:$0xff] }
  0x91   :  { %v100_v0 = vpop.permute.xlu0 %99 }
  0x92   :  { %v162_v16 = vsel %vm160_vm7, %v100_v0, %v118_v58  ;;  %v1744_v0 = vld [vmem:[%s2695_s7 + $0x30] sm:$0xff] }
  0x93   :  { %v134_v59 = vpop.permute.xlu1 %133 }
  0x95   :  { %v110_v2 = vpop.permute.xlu0 %109 }
  0x98   :  { %v146_v61 = vpop.permute.xlu1 %145 }
  0x9a   :  { %v150_v4 = vpop.permute.xlu0 %149 }
  0x9d   :  { %v105_v63 = vpop.permute.xlu1 %104 }
  0x9e   :  { %v154_v6 = vpop.permute.xlu0 %153 }
  0xa2   :  { %v122_v1 = vpop.permute.xlu1 %121  ;;  %v158_v8 = vpop.permute.xlu0 %157 }
  0xa6   :  { %v126_v3 = vpop.permute.xlu1 %125 }
  0xa7   :  { %v164_v43 = vsel %vm160_vm7, %v110_v2, %v126_v3  ;;  %v1742_v2 = vld [vmem:[%s2695_s7 + $0x20] sm:$0xff] }
  0xab   :  { %v138_v5 = vpop.permute.xlu1 %137 }
  0xaf   :  { %v142_v7 = vpop.permute.xlu1 %141 }
  0xb0   :  { %v169_v48 = vsel %vm165_vm8, %v164_v43, %v142_v7 }
  0xb1   :  { %v2418_v52 = vsel %vm170_vm9, %v169_v48, %v158_v8 }
  0xc4   :  { %v1912_v22 = vpop.f32.mrf.mxu1 }
  0xc5   :  { %v266_v23 = vadd.f32 %v1912_v22, %v1709_v20  ;;  %v167_v22 = vsel %vm165_vm8, %v162_v16, %v134_v59  ;;  %v1740_v16 = vld [vmem:[%s2694_s6 + $0xf0] sm:$0xff] }
  0xc6   :  { %v260_v24 = vpop.f32.mrf.mxu1 }
  0xc7   :  { %v270_v26 = vmax.f32 %v266_v23, 0.0  ;;  %v261_v27 = vadd.f32 %v1709_v20, %v260_v24  ;;  %v166_v20 = vsel %vm165_vm8, %v161_v13, %v130_v60 }
  0xc9   :  { %v269_v29 = vmax.f32 %v261_v27, 0.0  ;;  %1913 = vmatprep.subr.mxu1 %v270_v26 }
  0xca   :  { %1914 = vmatpush3.msra.mxu1 %v270_v26 }
  0xcb   :  { %1915 = vmatprep.subr.mxu1 %v269_v29 }
  0xcc   :  { %1916 = vmatpush3.msra.mxu1 %v269_v29 }
  0xcd   :  { %1918 = vmatmul.mubr.msk.f32.vlgmr.msra.gmra.mxu1 %vm271_vm2, %v2298_v32  ;;  %1961 = vmatprep.subr.mxu1 %v529_v30 }
  0xce   :  { %1962 = vmatpush3.msra.mxu1 %v529_v30  ;;  %1920 = vmatprep.mubr.msk.f32.mxu1 %vm271_vm2, %v2295_v31 }
  0xcf   :  { %1963 = vmatprep.subr.mxu1 %v528_v33 }
  0xd0   :  { %1964 = vmatpush3.msra.mxu1 %v528_v33 }
  0xd1   :  { %1921 = vmatmul.mubr.msk.f32.gmra.mxu1 %vm271_vm2, %v2306_v34  ;;  %1965 = vmatprep.subr.mxu1 %v527_v35 }
  0xd2   :  { %1966 = vmatpush3.msra.mxu1 %v527_v35  ;;  %1969 = vmatprep.mubr.msk.f32.mxu1 %vm160_vm7, %v269_v29  ;;  %v2396_v29 = vsel %vm170_vm9, %v166_v20, %v146_v61  ;;  %v2400_v35 = vsel %vm170_vm9, %v167_v22, %v150_v4  ;;  %v1738_v20 = vld [vmem:[%s2694_s6 + $0xe0] sm:$0xff]  ;;  %v1736_v22 = vld [vmem:[%s2694_s6 + $0xd0] sm:$0xff] }
  0xd3   :  { %1967 = vmatprep.subr.mxu1 %v526_v36 }
  0xd4   :  { %1968 = vmatpush3.msra.mxu1 %v526_v36 }
  0xd5   :  { %1970 = vmatmul.mubr.msk.f32.vlgmr.msra.gmra.mxu1 %vm160_vm7, %v270_v26  ;;  %v163_v26 = vsel %vm160_vm7, %v105_v63, %v122_v1  ;;  %v1745_v63 = vld [vmem:[%s2695_s7 + $0x38] sm:$0xff]  ;;  %v1743_v1 = vld [vmem:[%s2695_s7 + $0x28] sm:$0xff] }
  0xd6   :  { %v168_v37 = vsel %vm165_vm8, %v163_v26, %v138_v5  ;;  %2031 = vmatprep.subr.mxu0 %v1745_v63  ;;  %v1732_v26 = vld [vmem:[%s2694_s6 + $0xb0] sm:$0xff] }
  0xd7   :  { %v2409_v44 = vsel %vm170_vm9, %v168_v37, %v154_v6  ;;  %v1721_v6 = vld [vmem:[%s2693_s5 + $0x1] ss:$0 sm:$0xff] }
  0xd8   :  { %v1726_v37 = vld [vmem:[%s2694_s6 + $0x80] sm:$0xff] }
 0x18d   :  { %v1919_v51 = vpop.f32.mrf.mxu1 }
 0x18e   :  { %375 = vrot.lane.b32.xlu1 %v1919_v51, %s2189_s25 }
 0x18f   :  { %v350_v53 = vpop.f32.mrf.mxu1 }
 0x190   :  { %373 = vrot.lane.b32.xlu0 %v350_v53, %s2189_s25 }
 0x191   :  { %v2371_v55 = vpop.f32.mrf.mxu1 }
 0x192   :  { %387 = vrot.lane.b32.xlu1 %v1919_v51, %s2190_s28 }
 0x193   :  { %v360_v56 = vpop.f32.mrf.mxu1 }
 0x194   :  { %397 = vrot.lane.b32.xlu0 %v350_v53, %s2191_s2 }
 0x195   :  { %v1971_v3 = vpop.f32.mrf.mxu1 }
 0x196   :  { %399 = vrot.lane.b32.xlu1 %v1919_v51, %s2191_s2 }
 0x197   :  { %v602_v4 = vpop.f32.mrf.mxu1 }
 0x198   :  { %377 = vrot.lane.b32.xlu0 %v360_v56, %s2189_s25 }
 0x19a   :  { %385 = vrot.lane.b32.xlu1 %v350_v53, %s2190_s28 }
 0x19c   :  { %389 = vrot.lane.b32.xlu0 %v360_v56, %s2190_s28 }
 0x19e   :  { %379 = vrot.lane.b32.xlu1 %v2371_v55, %s2189_s25 }
 0x1a0   :  { %401 = vrot.lane.b32.xlu0 %v360_v56, %s2191_s2 }
 0x1a2   :  { %391 = vrot.lane.b32.xlu1 %v2371_v55, %s2190_s28 }
 0x1a6   :  { %403 = vrot.lane.b32.xlu1 %v2371_v55, %s2191_s2 }
 0x200   :  { %v376_v9 = vpop.permute.xlu1 %375 }
 0x201   :  { %v410_v21 = vsel %vm160_vm7, %v1919_v51, %v376_v9 }
 0x202   :  { %v374_v10 = vpop.permute.xlu0 %373 }
 0x203   :  { %v409_v23 = vsel %vm160_vm7, %v350_v53, %v374_v10 }
 0x204   :  { %v388_v11 = vpop.permute.xlu1 %387 }
 0x205   :  { %v414_v24 = vsel %vm165_vm8, %v410_v21, %v388_v11  ;;  %v1737_v21 = vld [vmem:[%s2694_s6 + $0xd8] sm:$0xff] }
 0x206   :  { %v398_v12 = vpop.permute.xlu0 %397 }
 0x208   :  { %v400_v14 = vpop.permute.xlu1 %399 }
 0x209   :  { %v418_v27 = vsel %vm170_vm9, %v414_v24, %v400_v14  ;;  %v1741_v14 = vld [vmem:[%s2694_s6 + $0xf8] sm:$0xff]  ;;  %v1734_v24 = vld [vmem:[%s2694_s6 + $0xc0] sm:$0xff] }
 0x20a   :  { %v378_v17 = vpop.permute.xlu0 %377  ;;  %v422_v38 = vmul.f32 %v418_v27, %v2400_v35  ;;  %v1731_v27 = vld [vmem:[%s2694_s6 + $0xa8] sm:$0xff] }
 0x20b   :  { %v411_v40 = vsel %vm160_vm7, %v360_v56, %v378_v17  ;;  %v2423_v56 = vshrl.u32 %v42_v15, 7  ;;  %v1739_v17 = vld [vmem:[%s2694_s6 + $0xe8] sm:$0xff] }
 0x20c   :  { %v386_v25 = vpop.permute.xlu1 %385 }
 0x20d   :  { %v413_v28 = vsel %vm165_vm8, %v409_v23, %v386_v25  ;;  %vm75_vm10 = vcmp.eq.s32.totalorder %v2423_v56, %v1704_v57  ;;  %v70_v60 = vadd.s32 8, %v2423_v56  ;;  %v1735_v23 = vld [vmem:[%s2694_s6 + $0xc8] sm:$0xff]  ;;  %v1733_v25 = vld [vmem:[%s2694_s6 + $0xb8] sm:$0xff] }
 0x20e   :  { %v390_v30 = vpop.permute.xlu0 %389  ;;  %v417_v33 = vsel %vm170_vm9, %v413_v28, %v398_v12  ;;  %v1730_v28 = vld [vmem:[%s2694_s6 + $0xa0] sm:$0xff] }
 0x20f   :  { %v421_v36 = vmul.f32 %v417_v33, %v2396_v29  ;;  %v415_v41 = vsel %vm165_vm8, %v411_v40, %v390_v30  ;;  %vm76_vm11 = vcmp.eq.s32.totalorder %v70_v60, %v1704_v57  ;;  %v1729_v30 = vld [vmem:[%s2694_s6 + $0x98] sm:$0xff]  ;;  %v1728_v33 = vld [vmem:[%s2694_s6 + $0x90] sm:$0xff] }
 0x210   :  { %v380_v39 = vpop.permute.xlu1 %379  ;;  %v2436_v62 = vsel %vm76_vm11, 1.0, %v2188_v18 }
 0x211   :  { %1955 = vmatprep.mubr.f32.mxu0 %v421_v36  ;;  %v412_v49 = vsel %vm160_vm7, %v2371_v55, %v380_v39  ;;  %v2430_v55 = vsel %vm75_vm10, 1.0, %v2188_v18  ;;  %v1727_v36 = vld [vmem:[%s2694_s6 + $0x88] sm:$0xff] }
 0x212   :  { %1956 = vmatmul.mubr.f32.vlgmr.msra.gmra.mxu0 %v422_v38  ;;  %v402_v42 = vpop.permute.xlu0 %401  ;;  %1980 = vmatprep.mubr.msk.f32.mxu1 %vm160_vm7, %v2430_v55 }
 0x213   :  { %v419_v45 = vsel %vm170_vm9, %v415_v41, %v402_v42  ;;  %2032 = vmatpush3.msra.mxu0 %v1745_v63 }
 0x214   :  { %v423_v46 = vmul.f32 %v419_v45, %v2409_v44  ;;  %v392_v47 = vpop.permute.xlu1 %391  ;;  %2033 = vmatprep.subr.mxu0 %v1744_v0 }
 0x215   :  { %v416_v50 = vsel %vm165_vm8, %v412_v49, %v392_v47  ;;  %2034 = vmatpush3.msra.mxu0 %v1744_v0 }
 0x216   :  { %1958 = vmatprep.mubr.f32.mxu0 %v423_v46  ;;  %2035 = vmatprep.subr.mxu0 %v1743_v1 }
 0x217   :  { %2036 = vmatpush3.msra.mxu0 %v1743_v1 }
 0x218   :  { %v404_v51 = vpop.permute.xlu1 %403  ;;  %2037 = vmatprep.subr.mxu0 %v1742_v2 }
 0x219   :  { %v420_v53 = vsel %vm170_vm9, %v416_v50, %v404_v51  ;;  %2038 = vmatpush3.msra.mxu0 %v1742_v2 }
 0x21a   :  { %v424_v54 = vmul.f32 %v420_v53, %v2418_v52 }
 0x21c   :  { %1959 = vmatmul.mubr.f32.gmra.mxu0 %v424_v54 }
 0x2d2   :  { %v1957_v58 = vpop.f32.mrf.mxu0 }
 0x2d4   :  { %v507_v59 = vpop.f32.mrf.mxu0 }
 0x2dc   :  { %v1960_v61 = vpop.f32.mrf.mxu0 }
 0x2dd   :  { %1972 = vmatprep.subr.mxu1 %v1960_v61 }
 0x2de   :  { %v517_v15 = vpop.f32.mrf.mxu0  ;;  %1973 = vmatpush3.msra.mxu1 %v1960_v61 }
 0x2df   :  { %1974 = vmatprep.subr.mxu1 %v517_v15 }
 0x2e0   :  { %1975 = vmatpush3.msra.mxu1 %v517_v15 }
 0x2e1   :  { %1976 = vmatprep.subr.mxu1 %v1957_v58 }
 0x2e2   :  { %1977 = vmatpush3.msra.mxu1 %v1957_v58 }
 0x2e3   :  { %1978 = vmatprep.subr.mxu1 %v507_v59 }
 0x2e4   :  { %1979 = vmatpush3.msra.mxu1 %v507_v59 }
 0x2e5   :  { %1981 = vmatmul.mubr.msk.f32.vlgmr.msra.gmra.mxu1 %vm160_vm7, %v2436_v62 }
 0x2e6   :  { %1987 = vmatprep.mubr.msk.f32.mxu1 %vm271_vm2, %v2284_v19 }
 0x3a5   :  { %v1982_v5 = vpop.f32.mrf.mxu1 }
 0x3a6   :  { %v689_v7 = vadd.f32 %v1982_v5, %v1971_v3 }
 0x3a7   :  { %v683_v8 = vpop.f32.mrf.mxu1 }
 0x3a8   :  { %v698_v9 = vadd.f32 %v1721_v6, %v689_v7  ;;  %v684_v10 = vadd.f32 %v683_v8, %v602_v4 }
 0x3aa   :  { %v700_v11 = vmax.f32 %v698_v9, 0.0  ;;  %v697_v12 = vadd.f32 %v1721_v6, %v684_v10 }
 0x3ac   :  { %v699_v13 = vmax.f32 %v697_v12, 0.0  ;;  %1983 = vmatprep.subr.mxu1 %v700_v11 }
 0x3ad   :  { %1984 = vmatpush3.msra.mxu1 %v700_v11 }
 0x3ae   :  { %1985 = vmatprep.subr.mxu1 %v699_v13  ;;  %2039 = vmatprep.mubr.msk.f32.mxu0 %vm160_vm7, %v699_v13 }
 0x3af   :  { %1986 = vmatpush3.msra.mxu1 %v699_v13  ;;  %2040 = vmatmul.mubr.msk.f32.vlgmr.msra.gmra.mxu0 %vm160_vm7, %v700_v11 }
 0x3b0   :  { %1988 = vmatmul.mubr.msk.f32.vlgmr.msra.gmra.mxu1 %vm271_vm2, %v2298_v32  ;;  %2050 = vmatprep.mubr.msk.f32.mxu0 %vm160_vm7, %v2430_v55 }
 0x3b1   :  { %1990 = vmatprep.mubr.msk.f32.mxu1 %vm271_vm2, %v2295_v31  ;;  %1993 = vmatprep.subr.mxu1 %v1741_v14 }
 0x3b2   :  { %1994 = vmatpush3.msra.mxu1 %v1741_v14  ;;  %v1774_v14 = vld [vmem:[%s2695_s7 + $0x58] sm:$0xff] }
 0x3b3   :  { %1995 = vmatprep.subr.mxu1 %v1740_v16 }
 0x3b4   :  { %1991 = vmatmul.mubr.msk.f32.gmra.mxu1 %vm271_vm2, %v2306_v34 }
 0x3b5   :  { %1996 = vmatpush3.msra.mxu1 %v1740_v16  ;;  %v1773_v16 = vld [vmem:[%s2695_s7 + $0x50] sm:$0xff] }
 0x3b6   :  { %1997 = vmatprep.subr.mxu1 %v1739_v17 }
 0x3b7   :  { %1998 = vmatpush3.msra.mxu1 %v1739_v17  ;;  %v1772_v17 = vld [vmem:[%s2695_s7 + $0x48] sm:$0xff] }
 0x3b8   :  { %1999 = vmatprep.subr.mxu1 %v1738_v20 }
 0x3b9   :  { %2000 = vmatpush3.msra.mxu1 %v1738_v20 }
 0x3ba   :  { %2001 = vmatprep.subr.mxu1 %v1737_v21 }
 0x3bb   :  { %2002 = vmatpush3.msra.mxu1 %v1737_v21 }
 0x3bc   :  { %2003 = vmatprep.subr.mxu1 %v1736_v22 }
 0x3bd   :  { %2004 = vmatpush3.msra.mxu1 %v1736_v22 }
 0x3be   :  { %2005 = vmatprep.subr.mxu1 %v1735_v23 }
 0x3bf   :  { %2006 = vmatpush3.msra.mxu1 %v1735_v23  ;;  %v1750_v23 = vld [vmem:[%s2693_s5 + $0x2] ss:$0 sm:$0xff] }
 0x3c0   :  { %2007 = vmatprep.subr.mxu1 %v1734_v24 }
 0x3c1   :  { %2008 = vmatpush3.msra.mxu1 %v1734_v24 }
 0x3c2   :  { %2009 = vmatprep.subr.mxu1 %v1733_v25 }
 0x3c3   :  { %2010 = vmatpush3.msra.mxu1 %v1733_v25 }
 0x3c4   :  { %2011 = vmatprep.subr.mxu1 %v1732_v26 }
 0x3c5   :  { %2012 = vmatpush3.msra.mxu1 %v1732_v26 }
 0x3c6   :  { %2013 = vmatprep.subr.mxu1 %v1731_v27 }
 0x3c7   :  { %2014 = vmatpush3.msra.mxu1 %v1731_v27 }
 0x3c8   :  { %2015 = vmatprep.subr.mxu1 %v1730_v28 }
 0x3c9   :  { %2016 = vmatpush3.msra.mxu1 %v1730_v28 }
 0x3ca   :  { %2017 = vmatprep.subr.mxu1 %v1729_v30 }
 0x3cb   :  { %2018 = vmatpush3.msra.mxu1 %v1729_v30 }
 0x3cc   :  { %2019 = vmatprep.subr.mxu1 %v1728_v33 }
 0x3cd   :  { %2020 = vmatpush3.msra.mxu1 %v1728_v33 }
 0x3ce   :  { %2021 = vmatprep.subr.mxu1 %v1727_v36 }
 0x3cf   :  { %2022 = vmatpush3.msra.mxu1 %v1727_v36  ;;  %v1770_v36 = vld [vmem:[%s2694_s6 + $0x178] sm:$0xff] }
 0x3d0   :  { %2023 = vmatprep.subr.mxu1 %v1726_v37 }
 0x3d1   :  { %2024 = vmatpush3.msra.mxu1 %v1726_v37  ;;  %v1769_v37 = vld [vmem:[%s2694_s6 + $0x170] sm:$0xff] }
 0x3d2   :  { %2101 = vmatprep.subr.mxu1 %v1774_v14 }
 0x46f   :  { %v2041_v20 = vpop.f32.mrf.mxu0 }
 0x470   :  { %v1989_v38 = vpop.f32.mrf.mxu1 }
 0x471   :  { %792 = vrot.lane.b32.xlu1 %v1989_v38, %s2189_s25  ;;  %v1021_v21 = vpop.f32.mrf.mxu0 }
 0x472   :  { %v767_v39 = vpop.f32.mrf.mxu1 }
 0x473   :  { %790 = vrot.lane.b32.xlu0 %v767_v39, %s2189_s25 }
 0x474   :  { %v1992_v40 = vpop.f32.mrf.mxu1 }
 0x475   :  { %804 = vrot.lane.b32.xlu1 %v1989_v38, %s2190_s28 }
 0x476   :  { %v777_v41 = vpop.f32.mrf.mxu1 }
 0x477   :  { %802 = vrot.lane.b32.xlu0 %v767_v39, %s2190_s28 }
 0x479   :  { %816 = vrot.lane.b32.xlu1 %v1989_v38, %s2191_s2 }
 0x47b   :  { %814 = vrot.lane.b32.xlu0 %v767_v39, %s2191_s2 }
 0x47d   :  { %796 = vrot.lane.b32.xlu1 %v1992_v40, %s2189_s25 }
 0x47f   :  { %794 = vrot.lane.b32.xlu0 %v777_v41, %s2189_s25 }
 0x481   :  { %808 = vrot.lane.b32.xlu1 %v1992_v40, %s2190_s28 }
 0x483   :  { %806 = vrot.lane.b32.xlu0 %v777_v41, %s2190_s28 }
 0x485   :  { %820 = vrot.lane.b32.xlu1 %v1992_v40, %s2191_s2 }
 0x487   :  { %818 = vrot.lane.b32.xlu0 %v777_v41, %s2191_s2 }
 0x4e3   :  { %v793_v42 = vpop.permute.xlu1 %792 }
 0x4e4   :  { %v827_v47 = vsel %vm160_vm7, %v1989_v38, %v793_v42  ;;  %v1764_v38 = vld [vmem:[%s2694_s6 + $0x148] sm:$0xff] }
 0x4e5   :  { %v791_v43 = vpop.permute.xlu0 %790  ;;  %v1760_v42 = vld [vmem:[%s2694_s6 + $0x128] sm:$0xff] }
 0x4e6   :  { %v826_v49 = vsel %vm160_vm7, %v767_v39, %v791_v43  ;;  %v1763_v39 = vld [vmem:[%s2694_s6 + $0x140] sm:$0xff] }
 0x4e7   :  { %v805_v45 = vpop.permute.xlu1 %804  ;;  %v1759_v43 = vld [vmem:[%s2694_s6 + $0x120] sm:$0xff] }
 0x4e8   :  { %v831_v50 = vsel %vm165_vm8, %v827_v47, %v805_v45  ;;  %v1758_v45 = vld [vmem:[%s2694_s6 + $0x118] sm:$0xff]  ;;  %v1756_v47 = vld [vmem:[%s2694_s6 + $0x108] sm:$0xff] }
 0x4e9   :  { %v803_v46 = vpop.permute.xlu0 %802 }
 0x4ea   :  { %v830_v51 = vsel %vm165_vm8, %v826_v49, %v803_v46  ;;  %v1757_v46 = vld [vmem:[%s2694_s6 + $0x110] sm:$0xff] }
 0x4eb   :  { %v817_v48 = vpop.permute.xlu1 %816 }
 0x4ec   :  { %v835_v53 = vsel %vm170_vm9, %v831_v50, %v817_v48  ;;  %v1755_v48 = vld [vmem:[%s2694_s6 + $0x100] sm:$0xff] }
 0x4ed   :  { %v815_v54 = vpop.permute.xlu0 %814  ;;  %v839_v60 = vmul.f32 %v835_v53, %v2400_v35 }
 0x4ee   :  { %v834_v57 = vsel %vm170_vm9, %v830_v51, %v815_v54 }
 0x4ef   :  { %v838_v58 = vmul.f32 %v834_v57, %v2396_v29  ;;  %v797_v59 = vpop.permute.xlu1 %796 }
 0x4f0   :  { %v829_v0 = vsel %vm160_vm7, %v1992_v40, %v797_v59  ;;  %v1762_v40 = vld [vmem:[%s2694_s6 + $0x138] sm:$0xff] }
 0x4f1   :  { %2025 = vmatprep.mubr.f32.mxu1 %v838_v58  ;;  %v795_v61 = vpop.permute.xlu0 %794 }
 0x4f2   :  { %2026 = vmatmul.mubr.f32.vlgmr.msra.gmra.mxu1 %v839_v60  ;;  %v828_v2 = vsel %vm160_vm7, %v777_v41, %v795_v61  ;;  %v1761_v41 = vld [vmem:[%s2694_s6 + $0x130] sm:$0xff] }
 0x4f3   :  { %v809_v15 = vpop.permute.xlu1 %808  ;;  %2102 = vmatpush3.msra.mxu1 %v1774_v14 }
 0x4f4   :  { %v833_v3 = vsel %vm165_vm8, %v829_v0, %v809_v15  ;;  %2103 = vmatprep.subr.mxu1 %v1773_v16 }
 0x4f5   :  { %v807_v63 = vpop.permute.xlu0 %806  ;;  %2104 = vmatpush3.msra.mxu1 %v1773_v16 }
 0x4f6   :  { %v832_v4 = vsel %vm165_vm8, %v828_v2, %v807_v63  ;;  %2105 = vmatprep.subr.mxu1 %v1772_v17 }
 0x4f7   :  { %v821_v1 = vpop.permute.xlu1 %820  ;;  %2106 = vmatpush3.msra.mxu1 %v1772_v17 }
 0x4f8   :  { %v837_v5 = vsel %vm170_vm9, %v833_v3, %v821_v1 }
 0x4f9   :  { %v819_v6 = vpop.permute.xlu0 %818  ;;  %v841_v9 = vmul.f32 %v837_v5, %v2418_v52 }
 0x4fa   :  { %v836_v7 = vsel %vm170_vm9, %v832_v4, %v819_v6 }
 0x4fb   :  { %v840_v8 = vmul.f32 %v836_v7, %v2409_v44 }
 0x4fd   :  { %2028 = vmatprep.mubr.f32.mxu1 %v840_v8 }
 0x4fe   :  { %2029 = vmatmul.mubr.f32.gmra.mxu1 %v841_v9 }
 0x5b2   :  { %v2027_v10 = vpop.f32.mrf.mxu1 }
 0x5b4   :  { %v925_v11 = vpop.f32.mrf.mxu1 }
 0x5be   :  { %v2030_v12 = vpop.f32.mrf.mxu1 }
 0x5bf   :  { %2042 = vmatprep.subr.mxu0 %v2030_v12 }
 0x5c0   :  { %v935_v13 = vpop.f32.mrf.mxu1  ;;  %2043 = vmatpush3.msra.mxu0 %v2030_v12 }
 0x5c1   :  { %2044 = vmatprep.subr.mxu0 %v935_v13 }
 0x5c2   :  { %2045 = vmatpush3.msra.mxu0 %v935_v13 }
 0x5c3   :  { %2046 = vmatprep.subr.mxu0 %v2027_v10 }
 0x5c4   :  { %2047 = vmatpush3.msra.mxu0 %v2027_v10 }
 0x5c5   :  { %2048 = vmatprep.subr.mxu0 %v925_v11 }
 0x5c6   :  { %2049 = vmatpush3.msra.mxu0 %v925_v11 }
 0x5c7   :  { %2051 = vmatmul.mubr.msk.f32.vlgmr.msra.gmra.mxu0 %vm160_vm7, %v2436_v62 }
 0x5c8   :  { %2057 = vmatprep.mubr.msk.f32.mxu0 %vm271_vm2, %v2284_v19  ;;  %v1771_v19 = vld [vmem:[%s2695_s7 + $0x40] sm:$0xff] }
 0x5c9   :  { %2107 = vmatprep.subr.mxu1 %v1771_v19 }
 0x5ca   :  { %2108 = vmatpush3.msra.mxu1 %v1771_v19 }
 0x687   :  { %v2052_v22 = vpop.f32.mrf.mxu0 }
 0x688   :  { %v1102_v24 = vadd.f32 %v2052_v22, %v2041_v20 }
 0x689   :  { %v1096_v25 = vpop.f32.mrf.mxu0 }
 0x68a   :  { %v1111_v26 = vadd.f32 %v1750_v23, %v1102_v24  ;;  %v1097_v27 = vadd.f32 %v1096_v25, %v1021_v21  ;;  %v1779_v25 = vld [vmem:[%s2693_s5 + $0x3] ss:$0 sm:$0xff] }
 0x68c   :  { %v1113_v28 = vmax.f32 %v1111_v26, 0.0  ;;  %v1110_v30 = vadd.f32 %v1750_v23, %v1097_v27  ;;  %v1707_v27 = vld [vmem:[%s2691_s3 + $0x1] ss:$0 sm:$0xff] }
 0x68d   :  { %vm85_vm13 = vcmp.eq.s32.totalorder %v2423_v56, %v1707_v27  ;;  %v1602_v56 = vld [vmem:[%s2696_s8 + $0x10] sm:$0xff] }
 0x68e   :  { %v1112_v33 = vmax.f32 %v1110_v30, 0.0  ;;  %2053 = vmatprep.subr.mxu0 %v1113_v28 }
 0x68f   :  { %2054 = vmatpush3.msra.mxu0 %v1113_v28 }
 0x690   :  { %2055 = vmatprep.subr.mxu0 %v1112_v33  ;;  %2109 = vmatprep.mubr.msk.f32.mxu1 %vm160_vm7, %v1112_v33 }
 0x691   :  { %2056 = vmatpush3.msra.mxu0 %v1112_v33  ;;  %2110 = vmatmul.mubr.msk.f32.vlgmr.msra.gmra.mxu1 %vm160_vm7, %v1113_v28 }
 0x692   :  { %2058 = vmatmul.mubr.msk.f32.vlgmr.msra.gmra.mxu0 %vm271_vm2, %v2298_v32  ;;  %2120 = vmatprep.mubr.msk.f32.mxu1 %vm160_vm7, %v2430_v55  ;;  %v1768_v32 = vld [vmem:[%s2694_s6 + $0x168] sm:$0xff]  ;;  %v1765_v55 = vld [vmem:[%s2694_s6 + $0x150] sm:$0xff] }
 0x693   :  { %2060 = vmatprep.mubr.msk.f32.mxu0 %vm271_vm2, %v2295_v31  ;;  %2063 = vmatprep.subr.mxu0 %v1770_v36  ;;  %v1767_v31 = vld [vmem:[%s2694_s6 + $0x160] sm:$0xff] }
 0x694   :  { %2064 = vmatpush3.msra.mxu0 %v1770_v36 }
 0x695   :  { %2065 = vmatprep.subr.mxu0 %v1769_v37 }
 0x696   :  { %2061 = vmatmul.mubr.msk.f32.gmra.mxu0 %vm271_vm2, %v2306_v34  ;;  %v1766_v34 = vld [vmem:[%s2694_s6 + $0x158] sm:$0xff] }
 0x697   :  { %2066 = vmatpush3.msra.mxu0 %v1769_v37 }
 0x698   :  { %2067 = vmatprep.subr.mxu0 %v1768_v32 }
 0x699   :  { %2068 = vmatpush3.msra.mxu0 %v1768_v32  ;;  %v1708_v32 = vsel %vm85_vm13, 1.0, %v2188_v18 }
 0x69a   :  { %2069 = vmatprep.subr.mxu0 %v1767_v31 }
 0x69b   :  { %2070 = vmatpush3.msra.mxu0 %v1767_v31  ;;  %v1603_v31 = vld [vmem:[%s2696_s8 + $0x18] sm:$0xff] }
 0x69c   :  { %2071 = vmatprep.subr.mxu0 %v1766_v34 }
 0x69d   :  { %2072 = vmatpush3.msra.mxu0 %v1766_v34  ;;  %v1601_v34 = vld [vmem:[%s2696_s8 + $0x8] sm:$0xff] }
 0x69e   :  { %2073 = vmatprep.subr.mxu0 %v1765_v55 }
 0x69f   :  { %2074 = vmatpush3.msra.mxu0 %v1765_v55  ;;  %v1600_v55 = vld [vmem:[%s2696_s8] sm:$0xff] }
 0x6a0   :  { %2075 = vmatprep.subr.mxu0 %v1764_v38 }
 0x6a1   :  { %2076 = vmatpush3.msra.mxu0 %v1764_v38 }
 0x6a2   :  { %2077 = vmatprep.subr.mxu0 %v1763_v39 }
 0x6a3   :  { %2078 = vmatpush3.msra.mxu0 %v1763_v39 }
 0x6a4   :  { %2079 = vmatprep.subr.mxu0 %v1762_v40 }
 0x6a5   :  { %2080 = vmatpush3.msra.mxu0 %v1762_v40  ;;  %v1781_v40 = vld [vmem:[%s2697_s9] ss:$0 sm:$0xff] }
 0x6a6   :  { %2081 = vmatprep.subr.mxu0 %v1761_v41 }
 0x6a7   :  { %2082 = vmatpush3.msra.mxu0 %v1761_v41 }
 0x6a8   :  { %2083 = vmatprep.subr.mxu0 %v1760_v42 }
 0x6a9   :  { %2084 = vmatpush3.msra.mxu0 %v1760_v42 }
 0x6aa   :  { %2085 = vmatprep.subr.mxu0 %v1759_v43 }
 0x6ab   :  { %2086 = vmatpush3.msra.mxu0 %v1759_v43 }
 0x6ac   :  { %2087 = vmatprep.subr.mxu0 %v1758_v45 }
 0x6ad   :  { %2088 = vmatpush3.msra.mxu0 %v1758_v45 }
 0x6ae   :  { %2089 = vmatprep.subr.mxu0 %v1757_v46 }
 0x6af   :  { %2090 = vmatpush3.msra.mxu0 %v1757_v46 }
 0x6b0   :  { %2091 = vmatprep.subr.mxu0 %v1756_v47 }
 0x6b1   :  { %2092 = vmatpush3.msra.mxu0 %v1756_v47 }
 0x6b2   :  { %2093 = vmatprep.subr.mxu0 %v1755_v48 }
 0x6b3   :  { %2094 = vmatpush3.msra.mxu0 %v1755_v48 }
 0x752   :  { %v2059_v49 = vpop.f32.mrf.mxu0 }
 0x753   :  { %1205 = vrot.lane.b32.xlu1 %v2059_v49, %s2189_s25 }
 0x754   :  { %v1180_v50 = vpop.f32.mrf.mxu0 }
 0x755   :  { %1203 = vrot.lane.b32.xlu0 %v1180_v50, %s2189_s25 }
 0x756   :  { %v2062_v51 = vpop.f32.mrf.mxu0 }
 0x757   :  { %1217 = vrot.lane.b32.xlu1 %v2059_v49, %s2190_s28 }
 0x758   :  { %v1190_v53 = vpop.f32.mrf.mxu0 }
 0x759   :  { %1215 = vrot.lane.b32.xlu0 %v1180_v50, %s2190_s28 }
 0x75b   :  { %1229 = vrot.lane.b32.xlu1 %v2059_v49, %s2191_s2 }
 0x75d   :  { %1227 = vrot.lane.b32.xlu0 %v1180_v50, %s2191_s2 }
 0x75f   :  { %1209 = vrot.lane.b32.xlu1 %v2062_v51, %s2189_s25 }
 0x761   :  { %1207 = vrot.lane.b32.xlu0 %v1190_v53, %s2189_s25 }
 0x763   :  { %1221 = vrot.lane.b32.xlu1 %v2062_v51, %s2190_s28 }
 0x765   :  { %1219 = vrot.lane.b32.xlu0 %v1190_v53, %s2190_s28 }
 0x767   :  { %1233 = vrot.lane.b32.xlu1 %v2062_v51, %s2191_s2 }
 0x769   :  { %1231 = vrot.lane.b32.xlu0 %v1190_v53, %s2191_s2 }
 0x7c5   :  { %v1206_v54 = vpop.permute.xlu1 %1205 }
 0x7c6   :  { %v1240_v60 = vsel %vm160_vm7, %v2059_v49, %v1206_v54 }
 0x7c7   :  { %v1204_v57 = vpop.permute.xlu0 %1203 }
 0x7c8   :  { %v1239_v15 = vsel %vm160_vm7, %v1180_v50, %v1204_v57 }
 0x7c9   :  { %v1218_v58 = vpop.permute.xlu1 %1217 }
 0x7ca   :  { %v1244_v63 = vsel %vm165_vm8, %v1240_v60, %v1218_v58 }
 0x7cb   :  { %v1216_v59 = vpop.permute.xlu0 %1215 }
 0x7cc   :  { %v1243_v0 = vsel %vm165_vm8, %v1239_v15, %v1216_v59 }
 0x7cd   :  { %v1230_v61 = vpop.permute.xlu1 %1229 }
 0x7ce   :  { %v1248_v1 = vsel %vm170_vm9, %v1244_v63, %v1230_v61 }
 0x7cf   :  { %v1228_v2 = vpop.permute.xlu0 %1227  ;;  %v1252_v6 = vmul.f32 %v1248_v1, %v2400_v35 }
 0x7d0   :  { %v1247_v3 = vsel %vm170_vm9, %v1243_v0, %v1228_v2 }
 0x7d1   :  { %v1251_v4 = vmul.f32 %v1247_v3, %v2396_v29  ;;  %v1210_v5 = vpop.permute.xlu1 %1209 }
 0x7d2   :  { %v1242_v10 = vsel %vm160_vm7, %v2062_v51, %v1210_v5 }
 0x7d3   :  { %2095 = vmatprep.mubr.f32.mxu0 %v1251_v4  ;;  %v1208_v7 = vpop.permute.xlu0 %1207 }
 0x7d4   :  { %2096 = vmatmul.mubr.f32.vlgmr.msra.gmra.mxu0 %v1252_v6  ;;  %v1241_v12 = vsel %vm160_vm7, %v1190_v53, %v1208_v7 }
 0x7d5   :  { %v1222_v8 = vpop.permute.xlu1 %1221 }
 0x7d6   :  { %v1246_v13 = vsel %vm165_vm8, %v1242_v10, %v1222_v8 }
 0x7d7   :  { %v1220_v9 = vpop.permute.xlu0 %1219 }
 0x7d8   :  { %v1245_v14 = vsel %vm165_vm8, %v1241_v12, %v1220_v9 }
 0x7d9   :  { %v1234_v11 = vpop.permute.xlu1 %1233 }
 0x7da   :  { %v1250_v16 = vsel %vm170_vm9, %v1246_v13, %v1234_v11 }
 0x7db   :  { %v1232_v29 = vpop.permute.xlu0 %1231  ;;  %v1254_v19 = vmul.f32 %v1250_v16, %v2418_v52 }
 0x7dc   :  { %v1249_v17 = vsel %vm170_vm9, %v1245_v14, %v1232_v29 }
 0x7dd   :  { %v1253_v35 = vmul.f32 %v1249_v17, %v2409_v44  ;;  %v2111_v44 = vpop.f32.mrf.mxu1 }
 0x7df   :  { %2098 = vmatprep.mubr.f32.mxu0 %v1253_v35  ;;  %v1434_v52 = vpop.f32.mrf.mxu1 }
 0x7e0   :  { %2099 = vmatmul.mubr.f32.gmra.mxu0 %v1254_v19 }
 0x894   :  { %v2097_v20 = vpop.f32.mrf.mxu0 }
 0x896   :  { %v1338_v21 = vpop.f32.mrf.mxu0 }
 0x8a0   :  { %v2100_v22 = vpop.f32.mrf.mxu0 }
 0x8a1   :  { %2112 = vmatprep.subr.mxu1 %v2100_v22 }
 0x8a2   :  { %v1348_v23 = vpop.f32.mrf.mxu0  ;;  %2113 = vmatpush3.msra.mxu1 %v2100_v22 }
 0x8a3   :  { %2114 = vmatprep.subr.mxu1 %v1348_v23 }
 0x8a4   :  { %2115 = vmatpush3.msra.mxu1 %v1348_v23 }
 0x8a5   :  { %2116 = vmatprep.subr.mxu1 %v2097_v20 }
 0x8a6   :  { %2117 = vmatpush3.msra.mxu1 %v2097_v20 }
 0x8a7   :  { %2118 = vmatprep.subr.mxu1 %v1338_v21 }
 0x8a8   :  { %2119 = vmatpush3.msra.mxu1 %v1338_v21 }
 0x8a9   :  { %2121 = vmatmul.mubr.msk.f32.vlgmr.msra.gmra.mxu1 %vm160_vm7, %v2436_v62  ;;  %2123 = vmatprep.subr.mxu1 %v2188_v18 }
 0x8aa   :  { %2127 = vmatprep.mubr.msk.f32.mxu1 %vm2192_vm12, %v2188_v18 }
 0x969   :  { %v2122_v24 = vpop.f32.mrf.mxu1 }
 0x96a   :  { %v1515_v26 = vadd.f32 %v2122_v24, %v2111_v44 }
 0x96b   :  { %v1509_v28 = vpop.f32.mrf.mxu1 }
 0x96c   :  { %v1524_v62 = vadd.f32 %v1779_v25, %v1515_v26  ;;  %v1510_v30 = vadd.f32 %v1509_v28, %v1434_v52 }
 0x96e   :  { %v1526_v33 = vmax.f32 %v1524_v62, 0.0  ;;  %v1523_v36 = vadd.f32 %v1779_v25, %v1510_v30 }
 0x970   :  { %v1525_v37 = vmax.f32 %v1523_v36, 0.0  ;;  %2124 = vmatpush3.msra.mxu1 %v1526_v33 }
 0x971   :  { %2125 = vmatprep.subr.mxu1 %v2188_v18 }
 0x972   :  { %2126 = vmatpush3.msra.mxu1 %v1525_v37 }
 0x973   :  { %2128 = vmatmul.mubr.msk.f32.vlgmr.msra.gmra.mxu1 %vm271_vm2, %v1708_v32  ;;  %2130 = vmatprep.subr.mxu1 %v2188_v18 }
 0x974   :  { %2131 = vmatpush3.msra.mxu1 %v1603_v31  ;;  %2138 = vmatprep.mubr.msk.f32.mxu1 %vm2192_vm12, %v2188_v18 }
 0x975   :  { %2132 = vmatprep.subr.mxu1 %v2188_v18 }
 0x976   :  { %2133 = vmatpush3.msra.mxu1 %v1602_v56 }
 0x977   :  { %2134 = vmatprep.subr.mxu1 %v2188_v18 }
 0x978   :  { %2135 = vmatpush3.msra.mxu1 %v1601_v34 }
 0x979   :  { %2136 = vmatprep.subr.mxu1 %v2188_v18 }
 0x97a   :  { %2137 = vmatpush3.msra.mxu1 %v1600_v55 }
 0xa33   :  { %v1596_v38 = vpop.f32.mrf.mxu1 }
 0xa34   :  { %2139 = vmatmul.mubr.msk.f32.vlgmr.msra.gmra.mxu1 %vm160_vm7, %v1596_v38 }
 0xa35   :  { %v2129_v39 = vpop.f32.mrf.mxu1 }
 0xaf4   :  { %v1680_v41 = vpop.f32.mrf.mxu1 }
 0xaf5   :  { %v1681_v42 = vadd.f32 %v1781_v40, %v1680_v41 }
 0xaf6   :  { %v2140_v18 = vpop.f32.mrf.mxu1 }
 0xaf7   :  { %1685 = vst.msk [vmem:[#allocation2] sm:$0x3] %vm1684_vm14, %v1681_v42 }
 0xaf8   :  { %2173 = shalt.err (!%p2170_p4)
}
 0xaf9   :  { %1695 = dma.vmem_to_hbm [thread:$0]  %s1693_s17, 32, %s2698_s10, [#allocation3]  }
 0xafa   :  { %2182 = dma.done.wait [#allocation3], 32  }
 0xafb   :  { %2183 = vsyncadd [#allocation3], 4294967264 }
 0xafc   :  { %1699 = vsyncpa [#allocation3], 1 }

</bundles_post_ra>
